<compile_context>
chip_gen: v5e
topology: v5e:2x2
jax: 0.10.0
libtpu: 0.0.40
codegen_flags: <defaults>
</compile_context>

<pallas_src>
import functools

import jax
import jax.numpy as jnp
from jax.experimental import pallas as pl
from jax.experimental.pallas import tpu as pltpu

_MAX_TB = 256           # rows gathered per grid step (amortizes per-step overhead)
_MAX_IDX_CHUNK = 32768  # bounds the scalar-prefetch SMEM footprint per pallas_call


def _round_up(x, m):
    return (x + m - 1) // m * m


def _gather_kernel(idx_ref, table_ref, out_ref, buf_ref, copy_sem):
    """Gather TB rows of the HBM embedding table into one output tile.

    idx_ref   : SMEM int32 (b_pad,)   -- scalar-prefetched global row indices
    table_ref : HBM  (N_total, D)     -- full embedding table (never in VMEM)
    out_ref   : VMEM (TB, D)          -- output tile for this grid step
    buf_ref   : VMEM (TB, D)          -- DMA landing buffer
    copy_sem  : DMA semaphore (byte-counting, shared by all TB row copies)
    """
    tb, _ = out_ref.shape
    i = pl.program_id(0)
    base = pl.multiple_of(i * tb, tb)

    # Issue: one small HBM->VMEM DMA per requested row; all TB copies are put
    # in flight before any wait so their latencies overlap.
    @pl.loop(0, tb)
    def _issue(r):
        g = idx_ref[base + r]
        pltpu.make_async_copy(
            table_ref.at[pl.ds(g, 1), :],
            buf_ref.at[pl.ds(r, 1), :],
            copy_sem,
        ).start()

    # Drain: wait for all TB row copies.  The wait descriptor only needs the
    # destination slice (for its byte count) -- the source index is irrelevant.
    @pl.loop(0, tb)
    def _drain(r):
        pltpu.make_async_copy(
            table_ref.at[pl.ds(0, 1), :],
            buf_ref.at[pl.ds(r, 1), :],
            copy_sem,
        ).wait()

    # Full-tile vector copy into the pipelined output block (lane-dense vst).
    out_ref[...] = buf_ref[...]


def _gather_rows(weight, gidx):
    """out[r, :] = weight[gidx[r], :] via per-row HBM->VMEM DMA gather."""
    n_total, d = weight.shape
    b = gidx.shape[0]
    tb = min(_MAX_TB, _round_up(b, 8))          # sublane-aligned tile height
    b_pad = _round_up(b, tb)
    # Pad with the dummy row so padded gathers are semantically inert.
    gidx_p = jnp.pad(gidx, (0, b_pad - b), constant_values=n_total - 1)

    out = pl.pallas_call(
        _gather_kernel,
        out_shape=jax.ShapeDtypeStruct((b_pad, d), weight.dtype),
        grid_spec=pltpu.PrefetchScalarGridSpec(
            num_scalar_prefetch=1,
            grid=(b_pad // tb,),
            in_specs=[
                pl.BlockSpec(memory_space=pl.ANY),      # table stays in HBM
            ],
            out_specs=pl.BlockSpec((tb, d), lambda i, idx: (i, 0)),
            scratch_shapes=[
                pltpu.VMEM((tb, d), weight.dtype),
                pltpu.SemaphoreType.DMA(()),
            ],
        ),
        compiler_params=pltpu.CompilerParams(
            dimension_semantics=("parallel",),          # independent tiles -> megacore
        ),
    )(gidx_p, weight)
    return out[:b]


@functools.partial(jax.jit, static_argnames=("start", "end"))
def _forward_with_batch(weight, batch, *, start, end):
    """emb = weight[start:end]; return emb.index_select(0, batch)."""
    # Bounds safety: TPU does not runtime-check DMA source addresses, so clamp
    # the per-type indices into [0, end-start-1] before offsetting.
    gidx = jnp.clip(batch.astype(jnp.int32), 0, end - start - 1) + jnp.int32(start)
    b = gidx.shape[0]
    # Chunk very large batches so the scalar-prefetch SMEM footprint stays bounded.
    outs = [
        _gather_rows(weight, gidx[s:min(s + _MAX_IDX_CHUNK, b)])
        for s in range(0, b, _MAX_IDX_CHUNK)
    ]
    return outs[0] if len(outs) == 1 else jnp.concatenate(outs, axis=0)


class MetaPath2VecForward:
    """Minimal JAX port holding just what forward() needs."""

    def __init__(self, num_nodes_dict, embedding_dim, key):
        types = sorted(num_nodes_dict.keys())
        self.start, self.end = {}, {}
        count = 0
        for k in types:
            self.start[k] = count
            count += num_nodes_dict[k]
            self.end[k] = count
        self.dummy_idx = count
        self.embedding_dim = embedding_dim
        # torch.nn.Embedding.reset_parameters() -> N(0, 1); keep float32 for
        # exact parity with the reference module.
        self.weight = jax.random.normal(
            key, (count + 1, embedding_dim), dtype=jnp.float32
        )

    def forward(self, node_type, batch=None):
        if batch is None:
            # pure contiguous slice, no gather hot-path -> plain JAX glue
            return self.weight[self.start[node_type]:self.end[node_type]]
        return _forward_with_batch(
            self.weight, batch,
            start=self.start[node_type], end=self.end[node_type],
        )


if __name__ == "__main__":
    key = jax.random.PRNGKey(0)
    k_emb, k_b1, k_b2 = jax.random.split(key, 3)

    # Small synthetic heterogeneous graph: two node types.
    num_nodes_dict = {"author": 16, "paper": 24}
    embedding_dim = 128

    model = MetaPath2VecForward(num_nodes_dict, embedding_dim, k_emb)

    # Small batch of node indices within the 'paper' node type (single tile).
    batch = jax.random.randint(
        k_b1, (8,), 0, num_nodes_dict["paper"], dtype=jnp.int32
    )
    out = jax.block_until_ready(model.forward("paper", batch))
    ref = model.weight[model.start["paper"]:model.end["paper"]][batch]
    assert out.shape == (8, embedding_dim)
    assert jnp.allclose(out, ref), "kernel output mismatch vs reference (small batch)"

    # Larger batch: exercises multi-step grid + dummy-row padding path.
    batch2 = jax.random.randint(
        k_b2, (300,), 0, num_nodes_dict["author"], dtype=jnp.int32
    )
    out2 = jax.block_until_ready(model.forward("author", batch2))
    ref2 = model.weight[model.start["author"]:model.end["author"]][batch2]
    assert out2.shape == (300, embedding_dim)
    assert jnp.allclose(out2, ref2), "kernel output mismatch vs reference (multi-tile)"

    # Also exercise the batch=None path (pure slice).
    full = jax.block_until_ready(model.forward("author"))
    assert full.shape == (num_nodes_dict["author"], embedding_dim)

    print("KERNEL_OK")
</pallas_src>

<mosaic_0001>
module attributes {stable_mosaic.version = 11 : i64} {
  func.func @_gather_kernel(%arg0: i32, %arg1: memref<8xi32, #tpu.memory_space<smem>>, %arg2: memref<41x128xf32, #tpu.memory_space<any>>, %arg3: memref<8x128xf32, #tpu.memory_space<vmem>>, %arg4: memref<8x128xf32, #tpu.memory_space<vmem>>, %arg5: memref<!tpu.dma_semaphore, #tpu.memory_space<semaphore_mem>>) attributes {dimension_semantics = [#tpu.dimension_semantics<parallel>], iteration_bounds = array<i64: 1>, scalar_prefetch = 1 : i64, scratch_operands = 2 : i64, tpu.core_type = #tpu.core_type<tc>, window_params = [{}, {transform_indices = @transform_1, window_bounds = array<i64: 8, 128>}]} {
    %c8_i32 = arith.constant 8 : i32
    %0 = arith.muli %arg0, %c8_i32 : i32
    %1 = tpu.assume_multiple %0, 8 : i32
    %c0_i32 = arith.constant 0 : i32
    %c8_i32_0 = arith.constant 8 : i32
    %2 = arith.addi %c0_i32, %c8_i32_0 : i32
    %c1_i32 = arith.constant 1 : i32
    scf.for %arg6 = %c0_i32 to %2 step %c1_i32  : i32 {
      %c1_i32_9 = arith.constant 1 : i32
      %6 = arith.muli %arg6, %c1_i32_9 : i32
      %c0_i32_10 = arith.constant 0 : i32
      %7 = arith.addi %c0_i32_10, %6 : i32
      %8 = arith.addi %1, %7 : i32
      %9 = arith.index_cast %8 : i32 to index
      %10 = memref.load %arg1[%9] : memref<8xi32, #tpu.memory_space<smem>>
      %c0_i32_11 = arith.constant 0 : i32
      %11 = tpu.memref_slice %arg2[%10, %c0_i32_11] : memref<41x128xf32, #tpu.memory_space<any>> -> memref<1x128xf32, #tpu.memory_space<any>>
      %c0_i32_12 = arith.constant 0 : i32
      %12 = tpu.memref_slice %arg4[%7, %c0_i32_12] : memref<8x128xf32, #tpu.memory_space<vmem>> -> memref<1x128xf32, #tpu.memory_space<vmem>>
      tpu.enqueue_dma source(%11 : memref<1x128xf32, #tpu.memory_space<any>>) target(%12 : memref<1x128xf32, #tpu.memory_space<vmem>>) target_semaphore(%arg5 : memref<!tpu.dma_semaphore, #tpu.memory_space<semaphore_mem>>)
    }
    %c8_i32_1 = arith.constant 8 : i32
    %c0_i32_2 = arith.constant 0 : i32
    %c8_i32_3 = arith.constant 8 : i32
    %3 = arith.addi %c0_i32_2, %c8_i32_3 : i32
    %c1_i32_4 = arith.constant 1 : i32
    scf.for %arg6 = %c0_i32_2 to %3 step %c1_i32_4  : i32 {
      %c1_i32_9 = arith.constant 1 : i32
      %6 = arith.muli %arg6, %c1_i32_9 : i32
      %c0_i32_10 = arith.constant 0 : i32
      %7 = arith.addi %c0_i32_10, %6 : i32
      %c0_i32_11 = arith.constant 0 : i32
      %c0_i32_12 = arith.constant 0 : i32
      %8 = tpu.memref_slice %arg2[%c0_i32_11, %c0_i32_12] : memref<41x128xf32, #tpu.memory_space<any>> -> memref<1x128xf32, #tpu.memory_space<any>>
      %c0_i32_13 = arith.constant 0 : i32
      %9 = tpu.memref_slice %arg4[%7, %c0_i32_13] : memref<8x128xf32, #tpu.memory_space<vmem>> -> memref<1x128xf32, #tpu.memory_space<vmem>>
      tpu.wait_dma2 semaphore(%arg5 : memref<!tpu.dma_semaphore, #tpu.memory_space<semaphore_mem>>) src(%8 : memref<1x128xf32, #tpu.memory_space<any>>) dst(%9 : memref<1x128xf32, #tpu.memory_space<vmem>>)
    }
    %c8_i32_5 = arith.constant 8 : i32
    %c0 = arith.constant 0 : index
    %c0_6 = arith.constant 0 : index
    %4 = vector.load %arg4[%c0, %c0_6] : memref<8x128xf32, #tpu.memory_space<vmem>>, vector<8x128xf32>
    %c0_7 = arith.constant 0 : index
    %c0_8 = arith.constant 0 : index
    %5 = vector.load %arg3[%c0_7, %c0_8] : memref<8x128xf32, #tpu.memory_space<vmem>>, vector<8x128xf32>
    tpu.vector_store %arg3[%c0_7, %c0_8], %4 {strides = array<i32>} : memref<8x128xf32, #tpu.memory_space<vmem>>, vector<8x128xf32>,
    return
  }
  func.func @transform_1(%arg0: i32, %arg1: memref<8xi32, #tpu.memory_space<smem>>) -> (i32, i32) {
    %c0_i32 = arith.constant 0 : i32
    %c0_i32_0 = arith.constant 0 : i32
    return %arg0, %c0_i32 : i32, i32
  }
}

</mosaic_0001>

<bundles_post_ra>
// kernel: _forward_with_batch.1
= control target key start
LH: loop header
LB: loop body
LE: loop exit
PB: predicated region body
PF: predicated region fallthrough
CT: control target
= control target key end

     0   :  { %s186_s12 = smov [#allocation5]   ;;  %s229_s0 = inlined_call_operand.vmem [shape: s32[8], index: 0, kind: input, shape index: {}]   ;;  %s230_s1 = inlined_call_operand.hbm [shape: f32[41,128], index: 1, kind: input, shape index: {}]   ;;  %s231_s2 = inlined_call_operand.hbm [shape: f32[8,128], index: 2, kind: output, shape index: {}]  }
   0x1   :  { %s8_s11 = sshll.u32 %s229_s0, 4  ;;  %s9_s11 = int_to_ptr.vmem [resolvable:$true] %s8_s11 }
   0x2   :  { %11 = dma.vmem_to_smem %s9_s11, 16, %s186_s12, [#allocation4] }
   0x3   :  { %172 = dma.done.wait [#allocation4], 16 }
   0x4   :  { %173 = vsyncadd [#allocation4], 4294967280 }
   0x5   :  { %14 = sfence }
   0x6   :  { %15 = vsyncpa [#allocation7], 0  ;;  %s207_s13 = smov 0  }
   0x7 LB: > { %s24_s14 = sld [smem:[#allocation5 + %s180_s13]]  ;;  %s26_s15 = scalar_lea.vmem [#allocation2], %s180_s13  ;;  %s180_s13 = sphi %s207_s13, %s22_s13  }
   0x8   : > { %s36_s16 = sshll.u32 %s26_s15, 4  ;;  %s120_s24 = scalar_lea.hbm %s230_s1, 48  ;;  %s37_s16 = int_to_ptr.vmem [resolvable:$true] %s36_s16 }
   0xd   : > { %s25_s18 = scalar_lea.hbm %s230_s1, %s24_s14 }
   0xe   : > { %s34_s19 = sshll.u32 %s25_s18, 4  ;;  %s35_s19 = int_to_ptr.hbm [resolvable:$true] %s34_s19 }
   0xf   : > { %s116_s20 = sshra.s32 %s35_s19, 4  ;;  %s117_s20 = int_to_ptr.hbm [resolvable:$true] %s116_s20 }
  0x10   : > { %s118_s21 = scalar_lea.hbm %s117_s20, 1  ;;  %p121_p1 = scmp.lt.s32.totalorder %s117_s20, %s230_s1 }
  0x11   : > { %p119_p0 = scmp.ne.s32.totalorder %s117_s20, %s118_s21  ;;  %p122_p2 = scmp.lt.s32.totalorder %s120_s24, %s118_s21 }
  0x13   : > { %p123_p3 = por %p122_p2, %p121_p1 }
  0x15   : > { %p124_p4 = pnand %p123_p3, %p119_p0 }
  0x17   : > { %127 = shalt.err (!%p124_p4)  }
  0x18   : > { %s128_s27 = sshra.s32 %s37_s16, 4  ;;  %s187_s29 = smov [#allocation2]   ;;  %s129_s27 = int_to_ptr.vmem [resolvable:$true] %s128_s27 }
  0x19   : > { %s130_s28 = scalar_lea.vmem %s129_s27, 1  ;;  %s132_s30 = scalar_lea.vmem %s187_s29, 8 }
  0x1a   : > { %p131_p5 = scmp.ne.s32.totalorder %s129_s27, %s130_s28  ;;  %p133_p6 = scmp.lt.s32.totalorder %s129_s27, [#allocation2] }
  0x1b   : > { %p134_p7 = scmp.lt.s32.totalorder %s132_s30, %s130_s28 }
  0x1d   : > { %p135_p8 = por %p134_p7, %p133_p6 }
  0x1f   : > { %p136_p9 = pnand %p135_p8, %p131_p5 }
  0x21   : > { %139 = shalt.err (!%p136_p9)  }
  0x22   : > { %39 = dma.hbm_to_vmem [thread:$0]  %s35_s19, 16, %s37_s16, [#allocation3] }
  0x23   : > { %s22_s13 = sadd.s32 1, %s180_s13  }
  0x24   : > { %p19_p10 = scmp.ge.s32.totalorder %s22_s13, 8  }
  0x25   :  { %s182_s3 = smov (%p19_p10), 0  }
  0x26   :  { %21 = sbr.rel (!%p19_p10) target bundleno = 7 (0x7), region = 40 }
  0x2b LB: > { %174 = dma.done.wait [#allocation3], 16  ;;  %s184_s3 = sphi %s182_s3, %s45_s3  }
  0x2c   : > { %175 = vsyncadd [#allocation3], 4294967280  ;;  %s45_s3 = sadd.s32 1, %s184_s3  }
  0x2d   : > { %p42_p11 = scmp.ge.s32.totalorder %s45_s3, 8  }
  0x2e   :  { %v49_v0 = vld [vmem:[#allocation2] sm:$0xff] (%p42_p11)  ;;  %s58_s6 = sshll.u32 (%p42_p11), %s231_s2, 4  ;;  %s188_s7 = smov (%p42_p11), [#allocation6]   ;;  %s59_s6 = int_to_ptr.hbm [resolvable:$true] %s58_s6 }
  0x2f   :  { %44 = sbr.rel (!%p42_p11) target bundleno = 43 (0x2b), region = 51  ;;  %50 = vst [vmem:[#allocation6] sm:$0xff] (%p42_p11), %v49_v0  ;;  %s56_s8 = sshll.u32 (%p42_p11), %s188_s7, 4  ;;  %s57_s8 = int_to_ptr.vmem [resolvable:$true] %s56_s8 }
  0x30   :  { %61 = dma.vmem_to_hbm [thread:$0]  (%p42_p11), %s57_s8, 128, %s59_s6, [#allocation7]  }
  0x34   :  { %176 = dma.done.wait [#allocation7], 128  }
  0x35   :  { %177 = vsyncadd [#allocation7], 4294967168 }
  0x36   :  { %66 = vsyncpa [#allocation7], 1 }
  0x37   :  { %67 = vsyncmov [#allocation3] }
  0x3a   :  { %s68_s1 = vpop.sfrf %67 }
  0x3b   :  { %p85_p12 = scmp.ne.s32.totalorder %s68_s1, 0 }
  0x3d   :  { %72 = shalt.err (%p85_p12)  }

</bundles_post_ra>
